<compile_context>
chip_gen: v6e
topology: v6e:2x2x1
jax: 0.10.0
libtpu: 0.0.40
codegen_flags: <defaults>
</compile_context>

<pallas_src>
import functools

import jax
import jax.numpy as jnp
from jax.experimental import pallas as pl
from jax.experimental.pallas import tpu as pltpu

SMOOTH = 1e-5
WEIGHT_CE = 1.0
WEIGHT_DICE = 1.0

_LANE = 128
_SUBLANE = 8
# Combined (logits + target) bytes streamed per grid step.  ~6 MiB keeps the ~0.35 us
# per-step overhead below ~15% of a step even at v7x's 3.2 TB/s HBM, while the
# double-buffered inputs plus compiler-managed f32 temporaries stay well inside the
# explicit VMEM limit below (and inside v7x's 64 MiB physical VMEM).
_COMBINED_BLOCK_BYTES = 6 * 1024 * 1024
_VMEM_LIMIT_BYTES = 48 * 1024 * 1024


def _round_up(a, m):
    return (a + m - 1) // m * m


def _stats_kernel(x_ref, t_ref, out_ref, *, S, n128, tiles_per_split, needs_mask):
    """Accumulate per-(split, batch, class) statistics over one spatial tile.

    x_ref:   (1, C, S, 128) logits (native dtype; cast to f32 per tile in-kernel)
    t_ref:   (1, C, S, 128) one-hot / region targets
    out_ref: (1, 1, C, 8) f32, resident across the spatial-tile grid axis:
      col 0: sum(sigmoid(x) * t)   col 1: sum(sigmoid(x))
      col 2: sum(t)                col 3: sum(bce_with_logits(x, t))
      cols 4..7 unused (stay zero)
    """
    @pl.when(pl.program_id(2) == 0)
    def _():
        out_ref[...] = jnp.zeros_like(out_ref)

    x = x_ref[0].astype(jnp.float32)   # (C, S, 128)
    t = t_ref[0].astype(jnp.float32)

    if needs_mask:
        # Global tile index of this (split, tile) grid point.  Rows >= rem are either the
        # ragged tail of the array (undefined VMEM contents!) or belong to a fully
        # out-of-range tile of this core split; force them to (-100, 0) BEFORE any
        # transcendental / multiply so they contribute exactly nothing (no 0*NaN).
        g = pl.program_id(0) * tiles_per_split + pl.program_id(2)
        rem = n128 - g * S
        row = jax.lax.broadcasted_iota(jnp.int32, x.shape, 1)
        valid = row < rem                       # all-True on interior tiles
        x = jnp.where(valid, x, -100.0)
        t = jnp.where(valid, t, 0.0)

    # Stable sigmoid + BCE-with-logits with 2 EUP pushes per element (tanh + log):
    #   sigmoid(x)      = 0.5 * (1 + tanh(x / 2))
    #   log(1 + e^-|x|) = -log(sigmoid(|x|))
    #   bce(x, t)       = max(x, 0) - x*t + log(1 + e^-|x|)
    # (x = -100 padding gives p = 0 and bce = 0 exactly.)
    p = 0.5 * (1.0 + jnp.tanh(0.5 * x))
    sig_abs = jnp.where(x >= 0, p, 1.0 - p)     # sigmoid(|x|)
    bce = jnp.maximum(x, 0.0) - x * t - jnp.log(sig_abs)

    def col(v):
        # Sublane-axis reduce (cheap vreg adds) then one cross-lane reduce per class.
        return jnp.sum(jnp.sum(v, axis=1), axis=-1)[:, None]   # (C, 1)

    out_ref[0, 0, :, 0:1] += col(p * t)
    out_ref[0, 0, :, 1:2] += col(p)
    out_ref[0, 0, :, 2:3] += col(t)
    out_ref[0, 0, :, 3:4] += col(bce)


@functools.partial(jax.jit, static_argnames=("block_bytes",))
def dc_and_bce_loss(net_output, target, *, block_bytes=_COMBINED_BLOCK_BYTES):
    B, C, H, W = net_output.shape
    HW = H * W
    x_item = jnp.dtype(net_output.dtype).itemsize
    t_item = jnp.dtype(target.dtype).itemsize

    # ---- spatial layout (B, C, n128, 128); pad (<=127 elems/row) only if HW % 128 != 0 ----
    hw_pad = _round_up(HW, _LANE)
    x = net_output.reshape(B, C, HW)
    t = target.reshape(B, C, HW)
    if hw_pad != HW:
        # Logits padded with -100 (sigmoid == 0, bce == 0 with t == 0) so padded lanes are inert.
        x = jnp.pad(x, ((0, 0), (0, 0), (0, hw_pad - HW)), constant_values=-100.0)
        t = jnp.pad(t, ((0, 0), (0, 0), (0, hw_pad - HW)))
    n128 = hw_pad // _LANE
    x = x.reshape(B, C, n128, _LANE)    # zero-copy reshapes
    t = t.reshape(B, C, n128, _LANE)

    # ---- tile the sublane-row axis; budget on x+t combined bytes per grid step ----
    bytes_per_row = C * _LANE * (x_item + t_item)
    s_cap = max(_SUBLANE, (block_bytes // bytes_per_row) // _SUBLANE * _SUBLANE)
    if n128 <= s_cap:
        S, n_tiles = n128, 1            # full extent: no (8,) divisibility required
    else:
        S, n_tiles = s_cap, pl.cdiv(n128, s_cap)

    # Split the spatial tiles across both v7x TensorCores (the batch axis alone leaves a core
    # idle for B == 1 / small odd B).  On single-TC v5e/v6e this is just a loop reorder.
    n_split = 2 if n_tiles >= 2 else 1
    tiles_per_split = pl.cdiv(n_tiles, n_split)
    needs_mask = (n_split * tiles_per_split * S) != n128

    def in_map(c, b, j):
        # Clamp so fully out-of-range tiles of a split re-fetch the last real block;
        # their contents are then value-masked to zero contribution inside the kernel.
        return (b, 0, jnp.minimum(c * tiles_per_split + j, n_tiles - 1), 0)

    kernel = functools.partial(
        _stats_kernel, S=S, n128=n128,
        tiles_per_split=tiles_per_split, needs_mask=needs_mask)

    cost = pl.CostEstimate(
        flops=22 * B * C * hw_pad,
        transcendentals=2 * B * C * hw_pad,
        bytes_accessed=B * C * hw_pad * (x_item + t_item) + n_split * B * C * 8 * 4,
    )

    stats = pl.pallas_call(
        kernel,
        out_shape=jax.ShapeDtypeStruct((n_split, B, C, 8), jnp.float32),
        grid_spec=pltpu.PrefetchScalarGridSpec(
            num_scalar_prefetch=0,
            grid=(n_split, B, tiles_per_split),
            in_specs=[
                pl.BlockSpec((1, C, S, _LANE), in_map),
                pl.BlockSpec((1, C, S, _LANE), in_map),
            ],
            # Constant block index along the tile axis -> resident accumulator block.
            out_specs=pl.BlockSpec((1, 1, C, 8), lambda c, b, j: (c, b, 0, 0)),
        ),
        compiler_params=pltpu.CompilerParams(
            dimension_semantics=("parallel", "parallel", "arbitrary"),
            vmem_limit_bytes=_VMEM_LIMIT_BYTES),
        cost_estimate=cost,
    )(x, t)

    per_bc = jnp.sum(stats, axis=0)     # (B, C, 8): combine the TensorCore-split partials
    intersect = per_bc[..., 0]
    sum_pred = per_bc[..., 1]
    sum_gt = per_bc[..., 2]
    bce_sum = jnp.sum(per_bc[..., 3])

    # BCEWithLogitsLoss(reduction='mean') over all (unpadded) elements.
    ce_loss = bce_sum / (B * C * HW)

    # MemoryEfficientSoftDiceLoss(apply_nonlin=sigmoid, batch_dice=True, do_bg=True, smooth=1e-5)
    i = jnp.sum(intersect, axis=0)      # batch_dice: sum over batch -> per-class
    sp = jnp.sum(sum_pred, axis=0)
    sg = jnp.sum(sum_gt, axis=0)
    dc = (2.0 * i + SMOOTH) / jnp.maximum(sp + sg + SMOOTH, 1e-8)
    dc_loss = -jnp.mean(dc)

    # TODO(synk): ddp=True AllGatherGrad path (cross-device batch_dice) not implemented.
    # TODO(synk): use_ignore_label=True path (mask = 1 - target[:, -1:]) not implemented.
    # TODO(synk): integer-label fast path (in-kernel one-hot, ~C x less target HBM traffic on
    #             v5e/v6e) not added because the module contract is one-hot region targets.
    return WEIGHT_CE * ce_loss + WEIGHT_DICE * dc_loss


def dc_and_bce_loss_ref(net_output, target):
    """Pure-JAX reference mirroring the PyTorch module semantics."""
    x = net_output.astype(jnp.float32)
    t = target.astype(jnp.float32)
    p = jax.nn.sigmoid(x)
    bce = jnp.maximum(x, 0.0) - x * t + jnp.log1p(jnp.exp(-jnp.abs(x)))
    ce_loss = jnp.mean(bce)

    axes = (2, 3)
    i = jnp.sum(p * t, axis=axes).sum(0)
    sp = jnp.sum(p, axis=axes).sum(0)
    sg = jnp.sum(t, axis=axes).sum(0)
    dc = (2.0 * i + SMOOTH) / jnp.maximum(sp + sg + SMOOTH, 1e-8)
    dc_loss = -jnp.mean(dc)

    return WEIGHT_CE * ce_loss + WEIGHT_DICE * dc_loss


if __name__ == "__main__":
    key = jax.random.PRNGKey(0)

    # Case 1: canonical small shape (128-aligned spatial -> single full tile, no masking).
    k1, k2 = jax.random.split(key)
    B, C, H, W = 2, 4, 16, 16
    net_output = jax.random.normal(k1, (B, C, H, W), dtype=jnp.float32)
    labels = jax.random.randint(k2, (B, H, W), 0, C, dtype=jnp.int32)
    # target must be one-hot encoded (region-based nnU-Net), same shape as net_output.
    target = jax.nn.one_hot(labels, C, axis=1, dtype=jnp.float32)
    out = jax.block_until_ready(dc_and_bce_loss(net_output, target))
    ref = dc_and_bce_loss_ref(net_output, target)
    assert jnp.allclose(out, ref, rtol=1e-4, atol=1e-5), (out, ref)

    # Case 2: non-128-aligned spatial extent + tiny block budget to exercise the lane
    # padding, the ragged-tail mask, and the 2-way TensorCore split of the spatial tiles.
    k3, k4 = jax.random.split(k1)
    B2, C2, H2, W2 = 1, 3, 37, 29
    net_output2 = jax.random.normal(k3, (B2, C2, H2, W2), dtype=jnp.float32)
    labels2 = jax.random.randint(k4, (B2, H2, W2), 0, C2, dtype=jnp.int32)
    target2 = jax.nn.one_hot(labels2, C2, axis=1, dtype=jnp.float32)
    out2 = jax.block_until_ready(
        dc_and_bce_loss(net_output2, target2, block_bytes=24 * 1024))
    ref2 = dc_and_bce_loss_ref(net_output2, target2)
    assert jnp.allclose(out2, ref2, rtol=1e-4, atol=1e-5), (out2, ref2)

    print("KERNEL_OK")
</pallas_src>

<mosaic_0001>
module attributes {stable_mosaic.version = 11 : i64} {
  func.func @_stats_kernel(%arg0: i32, %arg1: i32, %arg2: i32, %arg3: memref<1x4x2x128xf32, #tpu.memory_space<vmem>>, %arg4: memref<1x4x2x128xf32, #tpu.memory_space<vmem>>, %arg5: memref<1x1x4x8xf32, #tpu.memory_space<vmem>>) attributes {dimension_semantics = [#tpu.dimension_semantics<parallel>, #tpu.dimension_semantics<parallel>, #tpu.dimension_semantics<arbitrary>], iteration_bounds = array<i64: 1, 2, 1>, scalar_prefetch = 0 : i64, scratch_operands = 0 : i64, tpu.core_type = #tpu.core_type<tc>, window_params = [{transform_indices = @transform_0, window_bounds = array<i64: 1, 4, 2, 128>}, {transform_indices = @transform_1, window_bounds = array<i64: 1, 4, 2, 128>}, {transform_indices = @transform_2, window_bounds = array<i64: 1, 1, 4, 8>}]} {
    %c0_i32 = arith.constant 0 : i32
    %0 = arith.cmpi eq, %arg2, %c0_i32 : i32
    %1 = arith.extui %0 : i1 to i32
    %c0_i32_0 = arith.constant 0 : i32
    %2 = arith.cmpi ne, %1, %c0_i32_0 : i32
    scf.if %2 {
      %cst_50 = arith.constant 0.000000e+00 : f32
      %62 = vector.broadcast %cst_50 : f32 to vector<1x1x4x8xf32>
      %c0_51 = arith.constant 0 : index
      %c0_52 = arith.constant 0 : index
      %c0_53 = arith.constant 0 : index
      %c0_54 = arith.constant 0 : index
      %63 = vector.load %arg5[%c0_51, %c0_52, %c0_53, %c0_54] : memref<1x1x4x8xf32, #tpu.memory_space<vmem>>, vector<1x1x4x8xf32>
      tpu.vector_store %arg5[%c0_51, %c0_52, %c0_53, %c0_54], %62 {strides = array<i32>} : memref<1x1x4x8xf32, #tpu.memory_space<vmem>>, vector<1x1x4x8xf32>,
    } else {
    }
    %c0 = arith.constant 0 : index
    %c0_1 = arith.constant 0 : index
    %c0_2 = arith.constant 0 : index
    %c0_3 = arith.constant 0 : index
    %3 = vector.load %arg3[%c0, %c0_1, %c0_2, %c0_3] : memref<1x4x2x128xf32, #tpu.memory_space<vmem>>, vector<1x4x2x128xf32>
    %4 = vector.shape_cast %3 : vector<1x4x2x128xf32> to vector<4x2x128xf32>
    %c0_4 = arith.constant 0 : index
    %c0_5 = arith.constant 0 : index
    %c0_6 = arith.constant 0 : index
    %c0_7 = arith.constant 0 : index
    %5 = vector.load %arg4[%c0_4, %c0_5, %c0_6, %c0_7] : memref<1x4x2x128xf32, #tpu.memory_space<vmem>>, vector<1x4x2x128xf32>
    %6 = vector.shape_cast %5 : vector<1x4x2x128xf32> to vector<4x2x128xf32>
    %cst = arith.constant 5.000000e-01 : f32
    %7 = vector.broadcast %cst : f32 to vector<4x2x128xf32>
    %8 = arith.mulf %7, %4 : vector<4x2x128xf32>
    %9 = math.tanh %8 : vector<4x2x128xf32>
    %cst_8 = arith.constant 1.000000e+00 : f32
    %10 = vector.broadcast %cst_8 : f32 to vector<4x2x128xf32>
    %11 = arith.addf %10, %9 : vector<4x2x128xf32>
    %cst_9 = arith.constant 5.000000e-01 : f32
    %12 = vector.broadcast %cst_9 : f32 to vector<4x2x128xf32>
    %13 = arith.mulf %12, %11 : vector<4x2x128xf32>
    %cst_10 = arith.constant 0.000000e+00 : f32
    %14 = vector.broadcast %cst_10 : f32 to vector<4x2x128xf32>
    %15 = arith.cmpf oge, %4, %14 : vector<4x2x128xf32>
    %cst_11 = arith.constant 1.000000e+00 : f32
    %16 = vector.broadcast %cst_11 : f32 to vector<4x2x128xf32>
    %17 = arith.subf %16, %13 : vector<4x2x128xf32>
    %18 = arith.select %15, %13, %17 : vector<4x2x128xi1>, vector<4x2x128xf32>
    %cst_12 = arith.constant 0.000000e+00 : f32
    %19 = vector.broadcast %cst_12 : f32 to vector<4x2x128xf32>
    %20 = arith.maximumf %4, %19 : vector<4x2x128xf32>
    %21 = arith.mulf %4, %6 : vector<4x2x128xf32>
    %22 = arith.subf %20, %21 : vector<4x2x128xf32>
    %23 = math.log %18 : vector<4x2x128xf32>
    %24 = arith.subf %22, %23 : vector<4x2x128xf32>
    %c0_13 = arith.constant 0 : index
    %c0_14 = arith.constant 0 : index
    %c0_15 = arith.constant 0 : index
    %c0_16 = arith.constant 0 : index
    %25 = vector.load %arg5[%c0_13, %c0_14, %c0_15, %c0_16] : memref<1x1x4x8xf32, #tpu.memory_space<vmem>>, vector<1x1x4x1xf32>
    %26 = vector.shape_cast %25 : vector<1x1x4x1xf32> to vector<4x1xf32>
    %27 = arith.mulf %13, %6 : vector<4x2x128xf32>
    %cst_17 = arith.constant dense<0.000000e+00> : vector<4x128xf32>
    %28 = vector.multi_reduction <add>, %27, %cst_17 [1] : vector<4x2x128xf32> to vector<4x128xf32>
    %cst_18 = arith.constant dense<0.000000e+00> : vector<4xf32>
    %29 = vector.multi_reduction <add>, %28, %cst_18 [1] : vector<4x128xf32> to vector<4xf32>
    %30 = vector.shape_cast %29 : vector<4xf32> to vector<4x1xf32>
    %31 = arith.addf %26, %30 : vector<4x1xf32>
    %c0_19 = arith.constant 0 : index
    %c0_20 = arith.constant 0 : index
    %c0_21 = arith.constant 0 : index
    %c0_22 = arith.constant 0 : index
    %32 = vector.load %arg5[%c0_19, %c0_20, %c0_21, %c0_22] : memref<1x1x4x8xf32, #tpu.memory_space<vmem>>, vector<1x1x4x1xf32>
    %33 = vector.shape_cast %32 : vector<1x1x4x1xf32> to vector<4x1xf32>
    %34 = vector.shape_cast %31 : vector<4x1xf32> to vector<1x1x4x1xf32>
    tpu.vector_store %arg5[%c0_19, %c0_20, %c0_21, %c0_22], %34 {strides = array<i32>} : memref<1x1x4x8xf32, #tpu.memory_space<vmem>>, vector<1x1x4x1xf32>,
    %c0_23 = arith.constant 0 : index
    %c0_24 = arith.constant 0 : index
    %c0_25 = arith.constant 0 : index
    %c1 = arith.constant 1 : index
    %35 = vector.load %arg5[%c0_23, %c0_24, %c0_25, %c1] : memref<1x1x4x8xf32, #tpu.memory_space<vmem>>, vector<1x1x4x1xf32>
    %36 = vector.shape_cast %35 : vector<1x1x4x1xf32> to vector<4x1xf32>
    %cst_26 = arith.constant dense<0.000000e+00> : vector<4x128xf32>
    %37 = vector.multi_reduction <add>, %13, %cst_26 [1] : vector<4x2x128xf32> to vector<4x128xf32>
    %cst_27 = arith.constant dense<0.000000e+00> : vector<4xf32>
    %38 = vector.multi_reduction <add>, %37, %cst_27 [1] : vector<4x128xf32> to vector<4xf32>
    %39 = vector.shape_cast %38 : vector<4xf32> to vector<4x1xf32>
    %40 = arith.addf %36, %39 : vector<4x1xf32>
    %c0_28 = arith.constant 0 : index
    %c0_29 = arith.constant 0 : index
    %c0_30 = arith.constant 0 : index
    %c1_31 = arith.constant 1 : index
    %41 = vector.load %arg5[%c0_28, %c0_29, %c0_30, %c1_31] : memref<1x1x4x8xf32, #tpu.memory_space<vmem>>, vector<1x1x4x1xf32>
    %42 = vector.shape_cast %41 : vector<1x1x4x1xf32> to vector<4x1xf32>
    %43 = vector.shape_cast %40 : vector<4x1xf32> to vector<1x1x4x1xf32>
    tpu.vector_store %arg5[%c0_28, %c0_29, %c0_30, %c1_31], %43 {strides = array<i32>} : memref<1x1x4x8xf32, #tpu.memory_space<vmem>>, vector<1x1x4x1xf32>,
    %c0_32 = arith.constant 0 : index
    %c0_33 = arith.constant 0 : index
    %c0_34 = arith.constant 0 : index
    %c2 = arith.constant 2 : index
    %44 = vector.load %arg5[%c0_32, %c0_33, %c0_34, %c2] : memref<1x1x4x8xf32, #tpu.memory_space<vmem>>, vector<1x1x4x1xf32>
    %45 = vector.shape_cast %44 : vector<1x1x4x1xf32> to vector<4x1xf32>
    %cst_35 = arith.constant dense<0.000000e+00> : vector<4x128xf32>
    %46 = vector.multi_reduction <add>, %6, %cst_35 [1] : vector<4x2x128xf32> to vector<4x128xf32>
    %cst_36 = arith.constant dense<0.000000e+00> : vector<4xf32>
    %47 = vector.multi_reduction <add>, %46, %cst_36 [1] : vector<4x128xf32> to vector<4xf32>
    %48 = vector.shape_cast %47 : vector<4xf32> to vector<4x1xf32>
    %49 = arith.addf %45, %48 : vector<4x1xf32>
    %c0_37 = arith.constant 0 : index
    %c0_38 = arith.constant 0 : index
    %c0_39 = arith.constant 0 : index
    %c2_40 = arith.constant 2 : index
    %50 = vector.load %arg5[%c0_37, %c0_38, %c0_39, %c2_40] : memref<1x1x4x8xf32, #tpu.memory_space<vmem>>, vector<1x1x4x1xf32>
    %51 = vector.shape_cast %50 : vector<1x1x4x1xf32> to vector<4x1xf32>
    %52 = vector.shape_cast %49 : vector<4x1xf32> to vector<1x1x4x1xf32>
    tpu.vector_store %arg5[%c0_37, %c0_38, %c0_39, %c2_40], %52 {strides = array<i32>} : memref<1x1x4x8xf32, #tpu.memory_space<vmem>>, vector<1x1x4x1xf32>,
    %c0_41 = arith.constant 0 : index
    %c0_42 = arith.constant 0 : index
    %c0_43 = arith.constant 0 : index
    %c3 = arith.constant 3 : index
    %53 = vector.load %arg5[%c0_41, %c0_42, %c0_43, %c3] : memref<1x1x4x8xf32, #tpu.memory_space<vmem>>, vector<1x1x4x1xf32>
    %54 = vector.shape_cast %53 : vector<1x1x4x1xf32> to vector<4x1xf32>
    %cst_44 = arith.constant dense<0.000000e+00> : vector<4x128xf32>
    %55 = vector.multi_reduction <add>, %24, %cst_44 [1] : vector<4x2x128xf32> to vector<4x128xf32>
    %cst_45 = arith.constant dense<0.000000e+00> : vector<4xf32>
    %56 = vector.multi_reduction <add>, %55, %cst_45 [1] : vector<4x128xf32> to vector<4xf32>
    %57 = vector.shape_cast %56 : vector<4xf32> to vector<4x1xf32>
    %58 = arith.addf %54, %57 : vector<4x1xf32>
    %c0_46 = arith.constant 0 : index
    %c0_47 = arith.constant 0 : index
    %c0_48 = arith.constant 0 : index
    %c3_49 = arith.constant 3 : index
    %59 = vector.load %arg5[%c0_46, %c0_47, %c0_48, %c3_49] : memref<1x1x4x8xf32, #tpu.memory_space<vmem>>, vector<1x1x4x1xf32>
    %60 = vector.shape_cast %59 : vector<1x1x4x1xf32> to vector<4x1xf32>
    %61 = vector.shape_cast %58 : vector<4x1xf32> to vector<1x1x4x1xf32>
    tpu.vector_store %arg5[%c0_46, %c0_47, %c0_48, %c3_49], %61 {strides = array<i32>} : memref<1x1x4x8xf32, #tpu.memory_space<vmem>>, vector<1x1x4x1xf32>,
    return
  }
  func.func @transform_0(%arg0: i32, %arg1: i32, %arg2: i32) -> (i32, i32, i32, i32) {
    %c1_i32 = arith.constant 1 : i32
    %0 = arith.muli %arg0, %c1_i32 : i32
    %1 = arith.addi %0, %arg2 : i32
    %c0_i32 = arith.constant 0 : i32
    %2 = arith.minsi %1, %c0_i32 : i32
    %c0_i32_0 = arith.constant 0 : i32
    %c0_i32_1 = arith.constant 0 : i32
    %c0_i32_2 = arith.constant 0 : i32
    return %arg1, %c0_i32_0, %2, %c0_i32_1 : i32, i32, i32, i32
  }
  func.func @transform_1(%arg0: i32, %arg1: i32, %arg2: i32) -> (i32, i32, i32, i32) {
    %c1_i32 = arith.constant 1 : i32
    %0 = arith.muli %arg0, %c1_i32 : i32
    %1 = arith.addi %0, %arg2 : i32
    %c0_i32 = arith.constant 0 : i32
    %2 = arith.minsi %1, %c0_i32 : i32
    %c0_i32_0 = arith.constant 0 : i32
    %c0_i32_1 = arith.constant 0 : i32
    %c0_i32_2 = arith.constant 0 : i32
    return %arg1, %c0_i32_0, %2, %c0_i32_1 : i32, i32, i32, i32
  }
  func.func @transform_2(%arg0: i32, %arg1: i32, %arg2: i32) -> (i32, i32, i32, i32) {
    %c0_i32 = arith.constant 0 : i32
    %c0_i32_0 = arith.constant 0 : i32
    %c0_i32_1 = arith.constant 0 : i32
    return %arg0, %arg1, %c0_i32, %c0_i32_0 : i32, i32, i32, i32
  }
}

</mosaic_0001>

<bundles_post_ra>
// kernel: dc_and_bce_loss.1
= control target key start
LH: loop header
LB: loop body
LE: loop exit
PB: predicated region body
PF: predicated region fallthrough
CT: control target
= control target key end

     0   :  { %s701_s9 = smov 0   ;;  %s703_s10 = smov 0   ;;  %s858_s0 = inlined_call_operand.vmem [shape: f32[2,4,2,128], index: 0, kind: input, shape index: {}]   ;;  %s859_s1 = inlined_call_operand.vmem [shape: f32[2,4,2,128], index: 1, kind: input, shape index: {}]   ;;  %s860_s2 = inlined_call_operand.vmem [shape: f32[1,2,4,8], index: 2, kind: output, shape index: {}]  }
   0x1   :  { %s705_s11 = smov 0  }
   0x2 LB: > { %s27_s12 = sadd.s32 1, %s679_s10  ;;  %p610_p0 = scmp.ge.s32.totalorder %s683_s11, 1  ;;  %s683_s11 = sphi %s705_s11, %s12_s11   ;;  %s679_s10 = sphi %s703_s10, %s862_s10   ;;  %s675_s9 = sphi %s701_s9, %s861_s9  }
   0x3   : > { %p29_p1 = scmp.ge.s32.totalorder %s27_s12, 2  ;;  %p177_p2 = scmp.lt.s32.totalorder %s683_s11, 3 }
   0x5   : > { %s864_s12 = smov (%p29_p1, %s27_s12), 0  ;;  %p178_p3 = pnand %p610_p0, %p177_p2 }
   0x6   : > { %p222_p4 = scmp.lt.s32.totalorder (!%p178_p3), %s675_s9, 1 }
   0x7   : > { %181 = sbr.rel (%p178_p3) target bundleno = 232 (0xe8), region = 28 }
   0xc   : > { %s866_s9 = smov (!%p222_p4, %s675_s9), 1  ;;  %vm259_vm0 = vcmask 60416   ;;  %v685_v4 = vmov 0.0   ;;  %vm326_vm1 = vcmask 1041408   ;;  %vm359_vm2 = vcmask 1041409  }
   0xd   : > { %s618_s13 = sshll.u32 %s866_s9, 3  ;;  %s615_s14 = sshll.u32 %s866_s9, 2  ;;  %vm361_vm3 = vcmask 1042434   ;;  %vm363_vm4 = vcmask 1043459   ;;  %vm366_vm5 = vcmask 1043456   ;;  %vm371_vm10 = vcmask 3072  }
   0xe   : > { %s229_s17 = scalar_lea.vmem %s858_s0, %s618_s13  ;;  %s243_s20 = scalar_lea.vmem %s859_s1, %s618_s13  ;;  %vm414_vm11 = vcmask 11272   ;;  %vm457_vm12 = vcmask 19472   ;;  %vm500_vm13 = vcmask 27672  }
   0xf   : > { %s728_s23 = scalar_lea.vmem %s860_s2, %s615_s14  ;;  %v730_v0 = vld [vmem:[%s229_s17] sm:$0x3]  ;;  %v732_v1 = vld [vmem:[%s229_s17 + $0x2] sm:$0x3]  ;;  %v734_v2 = vld [vmem:[%s229_s17 + $0x4] sm:$0x3] }
  0x10   : > { %v736_v3 = vld [vmem:[%s229_s17 + $0x6] sm:$0x3]  ;;  %260 = vst.msk [vmem:[%s728_s23] sm:$0xf] %vm259_vm0, %v685_v4  ;;  %v739_v5 = vld [vmem:[%s243_s20] sm:$0x3] }
  0x11   : > { %v269_v6 = vmul.f32 0.5, %v730_v0  ;;  %v270_v7 = vmul.f32 0.5, %v732_v1  ;;  %v743_v8 = vld [vmem:[%s243_s20 + $0x2] sm:$0x3]  ;;  %v745_v9 = vld [vmem:[%s243_s20 + $0x4] sm:$0x3] }
  0x12   : > { %v271_v10 = vmul.f32 0.5, %v734_v2  ;;  %v272_v11 = vmul.f32 0.5, %v736_v3  ;;  %v417_v12 = vsel %vm326_vm1, %v739_v5, 0.0  ;;  %v424_v13 = vsel %vm326_vm1, %v743_v8, 0.0  ;;  %v755_v15 = vld [vmem:[%s243_s20 + $0x6] sm:$0x3] }
  0x13   : > { %645 = vtanh.f32 %v269_v6  ;;  %v431_v14 = vsel %vm326_vm1, %v745_v9, 0.0  ;;  %v418_v16 = vrot.slane %v417_v12, 4  ;;  %v425_v17 = vrot.slane %v424_v13, 4 }
  0x14   : > { %647 = vtanh.f32 %v270_v7  ;;  %v432_v18 = vrot.slane %v431_v14, 4  ;;  %v438_v19 = vsel %vm326_vm1, %v755_v15, 0.0  ;;  %vm285_vm6 = vcmp.ge.f32.partialorder %v730_v0, 0.0 }
  0x15   : > { %649 = vtanh.f32 %v271_v10  ;;  %v419_v20 = vadd.f32 %v418_v16, %v417_v12  ;;  %v426_v21 = vadd.f32 %v425_v17, %v424_v13  ;;  %v439_v23 = vrot.slane %v438_v19, 4 }
  0x16   : > { %651 = vtanh.f32 %v272_v11  ;;  %v433_v22 = vadd.f32 %v432_v18, %v431_v14  ;;  %vm286_vm7 = vcmp.ge.f32.partialorder %v732_v1, 0.0  ;;  %vm287_vm8 = vcmp.ge.f32.partialorder %v734_v2, 0.0 }
  0x17   : > { %v420_v24 = vrot.slane %v419_v20, 2  ;;  %v427_v25 = vrot.slane %v426_v21, 2  ;;  %v440_v27 = vadd.f32 %v439_v23, %v438_v19  ;;  %vm288_vm9 = vcmp.ge.f32.partialorder %v736_v3, 0.0 }
  0x18   : > { %v434_v26 = vrot.slane %v433_v22, 2 }
  0x19   : > { %v421_v28 = vadd.f32 %v420_v24, %v419_v20  ;;  %v428_v29 = vadd.f32 %v427_v25, %v426_v21  ;;  %v441_v31 = vrot.slane %v440_v27, 2 }
  0x1a   : > { %v435_v30 = vadd.f32 %v434_v26, %v433_v22 }
  0x1b   : > { %v422_v32 = vrot.slane %v421_v28, 1  ;;  %v429_v33 = vrot.slane %v428_v29, 1  ;;  %v442_v35 = vadd.f32 %v441_v31, %v440_v27 }
  0x1c   : > { %v436_v34 = vrot.slane %v435_v30, 1 }
  0x1d   : > { %v423_v36 = vadd.f32 %v422_v32, %v421_v28  ;;  %v430_v37 = vadd.f32 %v429_v33, %v428_v29  ;;  %v443_v39 = vrot.slane %v442_v35, 1 }
  0x1e   : > { %v437_v38 = vadd.f32 %v436_v34, %v435_v30 }
  0x1f   : > { %v449_v41 = vsel %vm359_vm2, %v430_v37, %v423_v36  ;;  %v444_v44 = vadd.f32 %v443_v39, %v442_v35 }
  0x20   : > { %v646_v40 = vpop.eup %645  ;;  %v450_v45 = vsel %vm361_vm3, %v437_v38, %v449_v41 }
  0x21   : > { %v648_v42 = vpop.eup %647  ;;  %v277_v43 = vadd.f32 1.0, %v646_v40  ;;  %v451_v51 = vsel %vm363_vm4, %v444_v44, %v450_v45 }
  0x22   : > { %v650_v46 = vpop.eup %649  ;;  %v278_v47 = vadd.f32 1.0, %v648_v42  ;;  %v453_v54 = vsel %vm366_vm5, %v451_v51, 0.0 }
  0x23   : > { %v652_v48 = vpop.eup %651  ;;  %v279_v49 = vadd.f32 1.0, %v650_v46  ;;  %v761_v50 = vmul.f32 0.5, %v277_v43  ;;  %454 = vadd.xlane.f32.xlu1 %v453_v54 }
  0x24   : > { %v280_v52 = vadd.f32 1.0, %v652_v48  ;;  %v764_v53 = vmul.f32 0.5, %v278_v47 }
  0x25   : > { %v767_v55 = vmul.f32 0.5, %v279_v49  ;;  %v322_v56 = vmul.f32 %v761_v50, %v739_v5  ;;  %v374_v57 = vsel %vm326_vm1, %v761_v50, 0.0  ;;  %v289_v58 = vsub.f32 1.0, %v761_v50 }
  0x26   : > { %v774_v59 = vmul.f32 0.5, %v280_v52  ;;  %v323_v60 = vmul.f32 %v764_v53, %v743_v8  ;;  %v375_v61 = vrot.slane %v374_v57, 4  ;;  %v381_v62 = vsel %vm326_vm1, %v764_v53, 0.0 }
  0x27   : > { %v324_v63 = vmul.f32 %v767_v55, %v745_v9  ;;  %v327_v4 = vsel %vm326_vm1, %v322_v56, 0.0  ;;  %v382_v6 = vrot.slane %v381_v62, 4  ;;  %v388_v7 = vsel %vm326_vm1, %v767_v55, 0.0 }
  0x28   : > { %v325_v10 = vmul.f32 %v774_v59, %v755_v15  ;;  %v328_v11 = vrot.slane %v327_v4, 4  ;;  %v334_v12 = vsel %vm326_vm1, %v323_v60, 0.0  ;;  %v376_v13 = vadd.f32 %v375_v61, %v374_v57 }
  0x29   : > { %v335_v14 = vrot.slane %v334_v12, 4  ;;  %v341_v16 = vsel %vm326_vm1, %v324_v63, 0.0  ;;  %v383_v17 = vadd.f32 %v382_v6, %v381_v62  ;;  %v389_v18 = vrot.slane %v388_v7, 4 }
  0x2a   : > { %v329_v19 = vadd.f32 %v328_v11, %v327_v4  ;;  %v342_v20 = vrot.slane %v341_v16, 4  ;;  %v348_v21 = vsel %vm326_vm1, %v325_v10, 0.0  ;;  %v377_v22 = vrot.slane %v376_v13, 2 }
  0x2b   : > { %v336_v23 = vadd.f32 %v335_v14, %v334_v12  ;;  %v349_v24 = vrot.slane %v348_v21, 4  ;;  %v384_v25 = vrot.slane %v383_v17, 2  ;;  %v390_v26 = vadd.f32 %v389_v18, %v388_v7 }
  0x2c   : > { %v330_v27 = vrot.slane %v329_v19, 2  ;;  %v343_v28 = vadd.f32 %v342_v20, %v341_v16  ;;  %v378_v29 = vadd.f32 %v377_v22, %v376_v13  ;;  %v395_v30 = vsel %vm326_vm1, %v774_v59, 0.0 }
  0x2d   : > { %v337_v31 = vrot.slane %v336_v23, 2  ;;  %v350_v32 = vadd.f32 %v349_v24, %v348_v21  ;;  %v385_v33 = vadd.f32 %v384_v25, %v383_v17  ;;  %v391_v34 = vrot.slane %v390_v26, 2 }
  0x2e   : > { %v331_v35 = vadd.f32 %v330_v27, %v329_v19  ;;  %v344_v36 = vrot.slane %v343_v28, 2  ;;  %v379_v37 = vrot.slane %v378_v29, 1  ;;  %v396_v38 = vrot.slane %v395_v30, 4 }
  0x2f   : > { %v338_v39 = vadd.f32 %v337_v31, %v336_v23  ;;  %v351_v40 = vrot.slane %v350_v32, 2  ;;  %v386_v41 = vrot.slane %v385_v33, 1  ;;  %v392_v42 = vadd.f32 %v391_v34, %v390_v26 }
  0x30   : > { %v332_v43 = vrot.slane %v331_v35, 1  ;;  %v345_v44 = vadd.f32 %v344_v36, %v343_v28  ;;  %v380_v45 = vadd.f32 %v379_v37, %v378_v29  ;;  %v397_v46 = vadd.f32 %v396_v38, %v395_v30 }
  0x31   : > { %v339_v47 = vrot.slane %v338_v39, 1  ;;  %v352_v48 = vadd.f32 %v351_v40, %v350_v32  ;;  %v387_v49 = vadd.f32 %v386_v41, %v385_v33  ;;  %v393_v51 = vrot.slane %v392_v42, 1 }
  0x32   : > { %v333_v52 = vadd.f32 %v332_v43, %v331_v35  ;;  %v346_v54 = vrot.slane %v345_v44, 1  ;;  %v398_v56 = vrot.slane %v397_v46, 2  ;;  %v290_v57 = vsub.f32 1.0, %v764_v53 }
  0x33   : > { %v340_v60 = vadd.f32 %v339_v47, %v338_v39  ;;  %v353_v61 = vrot.slane %v352_v48, 1  ;;  %v394_v62 = vadd.f32 %v393_v51, %v392_v42  ;;  %v406_v63 = vsel %vm359_vm2, %v387_v49, %v380_v45 }
  0x34   : > { %v347_v4 = vadd.f32 %v346_v54, %v345_v44  ;;  %v399_v6 = vadd.f32 %v398_v56, %v397_v46  ;;  %v291_v7 = vsub.f32 1.0, %v767_v55  ;;  %v292_v10 = vsub.f32 1.0, %v774_v59 }
  0x35   : > { %v354_v11 = vadd.f32 %v353_v61, %v352_v48  ;;  %v360_v12 = vsel %vm359_vm2, %v340_v60, %v333_v52  ;;  %v293_v13 = vsel %vm285_vm6, %v761_v50, %v289_v58  ;;  %v294_v17 = vsel %vm286_vm7, %v764_v53, %v290_v57 }
  0x36   : > { %v362_v14 = vsel %vm361_vm3, %v347_v4, %v360_v12  ;;  %v400_v16 = vrot.slane %v399_v6, 1  ;;  %v295_v18 = vsel %vm287_vm8, %v767_v55, %v291_v7  ;;  %v407_v20 = vsel %vm361_vm3, %v394_v62, %v406_v63 }
  0x37   : > { %v364_v19 = vsel %vm363_vm4, %v354_v11, %v362_v14  ;;  %v296_v21 = vsel %vm288_vm9, %v774_v59, %v292_v10  ;;  %653 = vlog2.f32 %v293_v13  ;;  %v301_v22 = vmul.f32 %v739_v5, %v730_v0 }
  0x38   : > { %v367_v50 = vsel %vm366_vm5, %v364_v19, 0.0  ;;  %v401_v58 = vadd.f32 %v400_v16, %v399_v6  ;;  %655 = vlog2.f32 %v294_v17  ;;  %v297_v23 = vmax.f32 %v730_v0, 0.0 }
  0x39   : > { %368 = vadd.xlane.f32.xlu0 %v367_v50  ;;  %657 = vlog2.f32 %v295_v18  ;;  %v302_v59 = vmul.f32 %v743_v8, %v732_v1  ;;  %v298_v24 = vmax.f32 %v732_v1, 0.0  ;;  %v303_v25 = vmul.f32 %v745_v9, %v734_v2  ;;  %v321_v18 = vld [vmem:[%s728_s23] sm:$0xf] }
  0x3a   : > { %v408_v53 = vsel %vm363_vm4, %v401_v58, %v407_v20  ;;  %659 = vlog2.f32 %v296_v21  ;;  %v299_v26 = vmax.f32 %v734_v2, 0.0  ;;  %v304_v27 = vmul.f32 %v755_v15, %v736_v3 }
  0x3b   : > { %v410_v55 = vsel %vm366_vm5, %v408_v53, 0.0  ;;  %v300_v28 = vmax.f32 %v736_v3, 0.0  ;;  %v305_v29 = vsub.f32 %v297_v23, %v301_v22  ;;  %v306_v5 = vsub.f32 %v298_v24, %v302_v59 }
  0x3c   : > { %v307_v0 = vsub.f32 %v299_v26, %v303_v25 }
  0x3d   : > { %411 = vadd.xlane.f32.xlu0 %v410_v55  ;;  %v308_v8 = vsub.f32 %v300_v28, %v304_v27 }
  0x44   : > { %v654_v30 = vpop.eup %653 }
  0x45   : > { %v656_v31 = vpop.eup %655  ;;  %v310_v32 = vmul.f32 0.6931472, %v654_v30 }
  0x46   : > { %v658_v33 = vpop.eup %657  ;;  %v312_v34 = vmul.f32 0.6931472, %v656_v31 }
  0x47   : > { %v660_v1 = vpop.eup %659  ;;  %v314_v35 = vmul.f32 0.6931472, %v658_v33  ;;  %v317_v36 = vsub.f32 %v305_v29, %v310_v32 }
  0x48   : > { %v316_v9 = vmul.f32 0.6931472, %v660_v1  ;;  %v318_v37 = vsub.f32 %v306_v5, %v312_v34 }
  0x49   : > { %v319_v2 = vsub.f32 %v307_v0, %v314_v35  ;;  %v460_v38 = vsel %vm326_vm1, %v317_v36, 0.0 }
  0x4a   : > { %v320_v15 = vsub.f32 %v308_v8, %v316_v9  ;;  %v461_v39 = vrot.slane %v460_v38, 4  ;;  %v467_v3 = vsel %vm326_vm1, %v318_v37, 0.0 }
  0x4b   : > { %v468_v40 = vrot.slane %v467_v3, 4  ;;  %v474_v41 = vsel %vm326_vm1, %v319_v2, 0.0 }
  0x4c   : > { %v462_v42 = vadd.f32 %v461_v39, %v460_v38  ;;  %v475_v43 = vrot.slane %v474_v41, 4  ;;  %v481_v44 = vsel %vm326_vm1, %v320_v15, 0.0 }
  0x4d   : > { %v469_v45 = vadd.f32 %v468_v40, %v467_v3  ;;  %v482_v46 = vrot.slane %v481_v44, 4 }
  0x4e   : > { %v463_v47 = vrot.slane %v462_v42, 2  ;;  %v476_v48 = vadd.f32 %v475_v43, %v474_v41 }
  0x4f   : > { %v470_v49 = vrot.slane %v469_v45, 2  ;;  %v483_v51 = vadd.f32 %v482_v46, %v481_v44 }
  0x50   : > { %v464_v52 = vadd.f32 %v463_v47, %v462_v42  ;;  %v477_v54 = vrot.slane %v476_v48, 2 }
  0x51   : > { %v471_v56 = vadd.f32 %v470_v49, %v469_v45  ;;  %v484_v57 = vrot.slane %v483_v51, 2 }
  0x52   : > { %v465_v60 = vrot.slane %v464_v52, 1  ;;  %v478_v61 = vadd.f32 %v477_v54, %v476_v48 }
  0x53   : > { %v472_v62 = vrot.slane %v471_v56, 1  ;;  %v485_v63 = vadd.f32 %v484_v57, %v483_v51 }
  0x54   : > { %v466_v4 = vadd.f32 %v465_v60, %v464_v52  ;;  %v479_v6 = vrot.slane %v478_v61, 1 }
  0x55   : > { %v473_v7 = vadd.f32 %v472_v62, %v471_v56  ;;  %v486_v10 = vrot.slane %v485_v63, 1 }
  0x56   : > { %v480_v11 = vadd.f32 %v479_v6, %v478_v61 }
  0x57   : > { %v487_v12 = vadd.f32 %v486_v10, %v485_v63  ;;  %v492_v13 = vsel %vm359_vm2, %v473_v7, %v466_v4 }
  0x58   : > { %v493_v14 = vsel %vm361_vm3, %v480_v11, %v492_v13 }
  0x59   : > { %v494_v16 = vsel %vm363_vm4, %v487_v12, %v493_v14 }
  0x5a   : > { %v496_v17 = vsel %vm366_vm5, %v494_v16, 0.0 }
  0x5b   : > { %497 = vadd.xlane.f32.xlu1 %v496_v17 }
  0xac   : > { %v455_v53 = vpop.xlane.xlu1 %454 }
  0xc2   : > { %v369_v19 = vpop.xlane.xlu0 %368 }
  0xc3   : > { %v370_v20 = vadd.f32 %v369_v19, %v321_v18 }
  0xc5   : > { %372 = vst.msk [vmem:[%s728_s23] sm:$0xf] %vm371_vm10, %v370_v20 }
  0xc6   : > { %v412_v21 = vpop.xlane.xlu0 %411 }
  0xcc   : > { %v373_v50 = vld [vmem:[%s728_s23] sm:$0xf] }
  0xcd   : > { %v413_v58 = vadd.f32 %v412_v21, %v373_v50 }
  0xcf   : > { %415 = vst.msk [vmem:[%s728_s23] sm:$0xf] %vm414_vm11, %v413_v58 }
  0xd6   : > { %v416_v55 = vld [vmem:[%s728_s23] sm:$0xf] }
  0xd7   : > { %v456_v22 = vadd.f32 %v455_v53, %v416_v55 }
  0xd9   : > { %458 = vst.msk [vmem:[%s728_s23] sm:$0xf] %vm457_vm12, %v456_v22 }
  0xe0   : > { %v459_v23 = vld [vmem:[%s728_s23] sm:$0xf] }
  0xe4   : > { %v498_v59 = vpop.xlane.xlu1 %497 }
  0xe5   : > { %v499_v24 = vadd.f32 %v498_v59, %v459_v23 }
  0xe7   : > { %501 = vst.msk [vmem:[%s728_s23] sm:$0xf] %vm500_vm13, %v499_v24 }
  0xe8 PF: > { %s12_s11 = sadd.s32 1, %s683_s11   ;;  %s861_s9 = smov %s679_s10 }
  0xe9   : > { %p9_p5 = scmp.ge.s32.totalorder %s12_s11, 4   ;;  %s862_s10 = smov %s864_s12 }
  0xeb   :  { %11 = sbr.rel (!%p9_p5) target bundleno = 2 (0x2), region = 65 }

</bundles_post_ra>
